<compile_context>
chip_gen: v6e
topology: v6e:2x2x1
jax: 0.10.0
libtpu: 0.0.40
codegen_flags: <defaults>
</compile_context>

<pallas_src>
import math
from functools import partial

import jax
import jax.numpy as jnp
from jax.experimental import pallas as pl
from jax.experimental.pallas import tpu as pltpu


# --------------------------------------------------------------------------
# Kernel: block transpose (covers both lane-preserving and lane-moving cases)
# --------------------------------------------------------------------------
def _permute_kernel(x_ref, o_ref, *, perm):
    o_ref[...] = jnp.transpose(x_ref[...], perm)


# --------------------------------------------------------------------------
# Helpers
# --------------------------------------------------------------------------
def _cdiv(a: int, b: int) -> int:
    return -(-a // b)


def _sublane_align(itemsize: int) -> int:
    return {4: 8, 2: 16, 1: 32}.get(itemsize, 8)


def _pick_tile(dim: int, align: int, target: int) -> int:
    """Largest aligned tile <= target (full dim is always allowed)."""
    if dim <= target:
        return dim
    t = max(align, (target // align) * align)
    return min(t, dim)


def _simplify(shape, perm):
    """Drop size-1 axes and merge runs that stay adjacent & in-order under perm."""
    n = len(shape)
    keep = [a for a in range(n) if shape[a] != 1]
    if not keep:
        return (), ()
    pos = {a: i for i, a in enumerate(keep)}
    kperm = [pos[p] for p in perm if p in pos]
    kshape = [shape[a] for a in keep]
    m = len(kshape)
    inv = [0] * m
    for j, a in enumerate(kperm):
        inv[a] = j
    groups = [[0]]
    for a in range(1, m):
        if inv[a] == inv[a - 1] + 1:          # adjacent and in-order in the output
            groups[-1].append(a)
        else:
            groups.append([a])
    rshape = []
    head_to_group = {}
    for gi, g in enumerate(groups):
        head_to_group[g[0]] = gi
        rshape.append(math.prod(kshape[a] for a in g))
    rperm = [head_to_group[a] for a in kperm if a in head_to_group]
    return tuple(rshape), tuple(rperm)


def _vmem_budgets():
    """(scoped vmem limit, per-block-buffer byte budget), per TPU generation."""
    try:
        cap = int(pltpu.get_tpu_info().vmem_capacity_bytes)
    except Exception:
        cap = 64 * 1024 * 1024                 # conservative (v7x) fallback
    limit = min(int(cap * 0.6), 96 * 1024 * 1024)
    per_buffer = max(512 * 1024, min(4 * 1024 * 1024, limit // 16))
    return limit, per_buffer


# --------------------------------------------------------------------------
# Wrapper
# --------------------------------------------------------------------------
def pallas_permute(x: jax.Array, perm: tuple[int, ...]) -> jax.Array:
    """Equivalent of torch `x.permute(*perm).contiguous()`."""
    perm = tuple(int(p) for p in perm)
    n = x.ndim
    assert sorted(perm) == list(range(n)), "perm must be a permutation of axes"
    out_shape = tuple(x.shape[p] for p in perm)

    rs, rp = _simplify(x.shape, perm)
    m = len(rs)
    if m <= 1:
        # Identity permutation (possibly modulo size-1 axes) — already contiguous.
        return jnp.reshape(x, out_shape)

    itemsize = jnp.dtype(x.dtype).itemsize
    sub = _sublane_align(itemsize)
    vmem_limit, per_buffer = _vmem_budgets()
    elems_budget = max(1, per_buffer // itemsize)

    rinv = [0] * m
    for j, a in enumerate(rp):
        rinv[a] = j

    # Alignment-carrying axes (as input-axis indices of the reduced problem).
    li, si = m - 1, m - 2          # input lane / sublane axes
    lo, so = rp[-1], rp[-2]        # input axes that become output lane / sublane

    aligns = [1] * m
    for a in (li, lo):
        aligns[a] = 128
    for a in (si, so):
        aligns[a] = max(aligns[a], sub)

    order = []
    for a in (lo, li, so, si):
        if a not in order:
            order.append(a)

    # Distribute the per-buffer budget across the constrained axes (each gets
    # at least one aligned granule), then batch the unconstrained leading axes.
    floors = {a: min(rs[a], aligns[a]) for a in order}
    rem_floor = math.prod(floors.values())
    tiles = [1] * m
    prod = 1
    for a in order:
        rem_floor //= floors[a]
        target = max(floors[a], elems_budget // max(prod * max(rem_floor, 1), 1))
        tiles[a] = _pick_tile(rs[a], aligns[a], target)
        prod *= tiles[a]
    for j in range(m - 1, -1, -1):             # innermost output axes first
        a = rp[j]
        if a in order:
            continue
        tiles[a] = min(rs[a], max(1, elems_budget // max(prod, 1)))
        prod *= tiles[a]

    # Degenerate-grid guard: make sure there are a few steps to pipeline and,
    # on v7x, to shard across the two TensorCores.
    def _steps():
        return math.prod(_cdiv(rs[a], tiles[a]) for a in range(m))

    for _ in range(16):
        if _steps() >= 4:
            break
        best, best_ratio = -1, 1.0
        for a in range(m):
            r = tiles[a] / aligns[a]
            if r > best_ratio:
                best, best_ratio = a, r
        if best < 0:
            break
        al = aligns[best]
        new = max(al, ((tiles[best] // 2 + al - 1) // al) * al)
        if new >= tiles[best]:
            break
        tiles[best] = new

    grid = tuple(_cdiv(rs[rp[j]], tiles[rp[j]]) for j in range(m))
    in_block = tuple(tiles)
    out_block = tuple(tiles[rp[j]] for j in range(m))

    def in_index_map(*g):
        # Grid axis j walks output axis j (= input axis rp[j]); the input block
        # index along input axis a is therefore the grid index at position rinv[a].
        return tuple(g[rinv[a]] for a in range(m))

    def out_index_map(*g):
        return tuple(g)

    x_r = jnp.reshape(x, rs)                   # merge collapsed runs (free)
    y_r = pl.pallas_call(
        partial(_permute_kernel, perm=rp),
        out_shape=jax.ShapeDtypeStruct(tuple(rs[a] for a in rp), x.dtype),
        grid=grid,
        in_specs=[pl.BlockSpec(in_block, in_index_map)],
        out_specs=pl.BlockSpec(out_block, out_index_map),
        compiler_params=pltpu.CompilerParams(
            dimension_semantics=("parallel",) * m,
            vmem_limit_bytes=vmem_limit,
        ),
    )(x_r)
    return jnp.reshape(y_r, out_shape)         # split merged runs back (free)


class Permute:
    """Mirror of the PyTorch module: holds the permutation in __init__."""

    def __init__(self, *args):
        self.args = args

    def __call__(self, x: jax.Array) -> jax.Array:
        return pallas_permute(x, tuple(self.args))


if __name__ == "__main__":
    key = jax.random.PRNGKey(0)

    # Small NCHW input, as the conv-style modules around Permute in vmamba2 use.
    x = jax.random.normal(key, (2, 4, 16, 16), dtype=jnp.float32)

    checks = [
        (0, 2, 3, 1),   # NCHW -> NHWC: minor axis moves -> XLU transpose tiles
        (3, 1, 0, 2),   # generic permute that also moves the minor axis
        (1, 0, 2, 3),   # leading-axes-only permute -> lane-preserving path
        (0, 1, 2, 3),   # identity -> simplification short-circuit
    ]
    for perm in checks:
        y = jax.block_until_ready(Permute(*perm)(x))
        ref = jnp.transpose(x, perm)
        assert y.shape == ref.shape, (perm, y.shape, ref.shape)
        assert y.dtype == ref.dtype
        assert bool(jnp.array_equal(y, ref)), f"mismatch vs reference for perm={perm}"

    print("KERNEL_OK")
</pallas_src>

<mosaic_0001>
module attributes {stable_mosaic.version = 11 : i64} {
  func.func @_permute_kernel(%arg0: i32, %arg1: i32, %arg2: i32, %arg3: memref<1x4x128xf32, #tpu.memory_space<vmem>>, %arg4: memref<1x128x4xf32, #tpu.memory_space<vmem>>) attributes {dimension_semantics = [#tpu.dimension_semantics<parallel>, #tpu.dimension_semantics<parallel>, #tpu.dimension_semantics<parallel>], iteration_bounds = array<i64: 2, 2, 1>, scalar_prefetch = 0 : i64, scratch_operands = 0 : i64, tpu.core_type = #tpu.core_type<tc>, window_params = [{transform_indices = @transform_0, window_bounds = array<i64: 1, 4, 128>}, {transform_indices = @transform_1, window_bounds = array<i64: 1, 128, 4>}]} {
    %c0 = arith.constant 0 : index
    %c0_0 = arith.constant 0 : index
    %c0_1 = arith.constant 0 : index
    %0 = vector.load %arg3[%c0, %c0_0, %c0_1] : memref<1x4x128xf32, #tpu.memory_space<vmem>>, vector<1x4x128xf32>
    %1 = tpu.transpose %0, [0, 2, 1] : vector<1x4x128xf32> -> vector<1x128x4xf32>
    %c0_2 = arith.constant 0 : index
    %c0_3 = arith.constant 0 : index
    %c0_4 = arith.constant 0 : index
    %2 = vector.load %arg4[%c0_2, %c0_3, %c0_4] : memref<1x128x4xf32, #tpu.memory_space<vmem>>, vector<1x128x4xf32>
    tpu.vector_store %arg4[%c0_2, %c0_3, %c0_4], %1 {strides = array<i32>} : memref<1x128x4xf32, #tpu.memory_space<vmem>>, vector<1x128x4xf32>,
    return
  }
  func.func @transform_0(%arg0: i32, %arg1: i32, %arg2: i32) -> (i32, i32, i32) {
    %c0_i32 = arith.constant 0 : i32
    return %arg0, %arg2, %arg1 : i32, i32, i32
  }
  func.func @transform_1(%arg0: i32, %arg1: i32, %arg2: i32) -> (i32, i32, i32) {
    %c0_i32 = arith.constant 0 : i32
    return %arg0, %arg1, %arg2 : i32, i32, i32
  }
}

</mosaic_0001>

<bundles_post_ra>
// kernel: tpu_custom_call.1
= control target key start
LH: loop header
LB: loop body
LE: loop exit
PB: predicated region body
PF: predicated region fallthrough
CT: control target
= control target key end

     0   :  { %6 = vsyncpa [#allocation3], 0  ;;  %s695_s0 = inlined_call_operand.hbm [shape: f32[2,4,256], index: 0, kind: input, shape index: {}]   ;;  %s696_s1 = inlined_call_operand.vmem [shape: f32[2,256,4], index: 1, kind: output, shape index: {}]  }
   0x1   :  { %8 = vsyncpa [#allocation3 + $0x1], 0  ;;  %s535_s6 = smov 0   ;;  %s537_s7 = smov 0  }
   0x2   :  { %s539_s8 = smov 0   ;;  %s541_s9 = smov 0  }
   0x3   :  { %s543_s10 = smov 0   ;;  %s545_s11 = smov 0  }
   0x4   :  { %s547_s12 = smov 0   ;;  %s549_s13 = smov 0  }
   0x5 LB: > { %s342_s14 = sadd.s32 4294967295, %s522_s13   ;;  %s29_s15 = sadd.s32 1, %s514_s11  ;;  %s522_s13 = sphi %s549_s13, %s14_s13   ;;  %s518_s12 = sphi %s547_s12, %s706_s12   ;;  %s514_s11 = sphi %s545_s11, %s705_s11   ;;  %s510_s10 = sphi %s543_s10, %s704_s10   ;;  %s506_s9 = sphi %s541_s9, %s703_s9   ;;  %s502_s8 = sphi %s539_s8, %s702_s8   ;;  %s498_s7 = sphi %s537_s7, %s701_s7   ;;  %s494_s6 = sphi %s535_s6, %s700_s6  }
   0x6   : > { %p31_p0 = scmp.ge.s32.totalorder %s29_s15, 2  ;;  %s33_s16 = sadd.s32 1, %s518_s12 }
   0x7   : > { %s44_s17 = sadd.s32 1, %s502_s8  ;;  %p51_p1 = scmp.ne.s32.totalorder %s502_s8, %s498_s7 }
   0x8   : > { %s708_s15 = smov (%p31_p0, %s29_s15), 0  ;;  %s710_s16 = smov (!%p31_p0, %s33_s16), %s518_s12 }
   0x9   : > { %s40_s18 = ssub.s32 %s514_s11, %s708_s15  ;;  %p52_p2 = scmp.eq.s32.totalorder %s522_s13, 0 }
   0xa   : > { %p35_p3 = scmp.ge.s32.totalorder %s710_s16, 2  ;;  %p57_p4 = scmp.ne.s32.totalorder %s498_s7, %s494_s6 }
   0xb   : > { %p586_p5 = por %p52_p2, %p51_p1  ;;  %p58_p6 = scmp.eq.s32.totalorder %s342_s14, 0 }
   0xc   : > { %s712_s16 = smov (%p35_p3, %s710_s16), 0  ;;  %p362_p8 = scmp.lt.s32.totalorder %s522_s13, 4 }
   0xd   : > { %p592_p7 = por %p58_p6, %p57_p4  ;;  %s37_s21 = ssub.s32 %s518_s12, %s712_s16 }
   0xe   : > { %s41_s22 = sor.u32 %s40_s18, %s37_s21  ;;  %s111_s23 = sand.u32 1, %s502_s8  }
   0xf   : > { %p42_p9 = scmp.eq.s32.totalorder %s41_s22, 0  ;;  %s346_s24 = sshll.u32 %s111_s23, 2 }
  0x10   : > { %s347_s25 = sshll.u32 %s518_s12, 1  ;;  %s115_s29 = scalar_lea.vmem [#allocation2], %s346_s24 }
  0x11   : > { %s602_s26 = scalar_select %p42_p9, %s502_s8, %s44_s17  }
  0x12   : > { %s122_s27 = sadd.s32 %s514_s11, %s347_s25  ;;  %s126_s30 = sshll.u32 %s115_s29, 4  ;;  %s127_s30 = int_to_ptr.vmem [resolvable:$true] %s126_s30 }
  0x13   : > { %s348_s28 = sshll.u32 %s122_s27, 6  ;;  %p612_p10 = pnand %p362_p8, %p586_p5 }
  0x14   : > { %s124_s4 = scalar_lea.hbm %s695_s0, %s348_s28  ;;  %p349_p11 = scmp.ge.s32.totalorder %s522_s13, 1 }
  0x15   : > { %p131_p12 = scmp.lt.s32.totalorder %s522_s13, 5  ;;  %s112_s6 = scalar_lea.sflag [#allocation3], %s111_s23 }
  0x16   : > { %p430_p13 = pneg %p612_p10  ;;  %s441_s14 = scalar_lea.vmem %s127_s30, 64 }
  0x17   : > { %p442_p0 = scmp.ne.s32.totalorder %s127_s30, %s441_s14  ;;  %s524_s17 = smov [#allocation2]  }
  0x18   : > { %s446_s18 = sshll.u32 %s524_s17, 4  ;;  %s447_s18 = int_to_ptr.vmem [resolvable:$false] %s446_s18 }
  0x19   : > { %p444_p1 = pnand %p442_p0, %p430_p13  ;;  %s448_s21 = scalar_lea.vmem %s447_s18, 128 }
  0x1a   : > { %p449_p3 = scmp.lt.s32.totalorder %s127_s30, %s447_s18  ;;  %p450_p4 = scmp.lt.s32.totalorder %s448_s21, %s441_s14 }
  0x1b   : > { %p445_p2 = pneg %p444_p1 }
  0x1c   : > { %p451_p5 = por %p450_p4, %p449_p3 }
  0x1e   : > { %p452_p6 = pnand %p451_p5, %p445_p2 }
  0x20   : > { %455 = shalt.err (!%p452_p6)
}
  0x21   : > { %361 = dma.hbm_to_vmem [thread:$0]  (!%p612_p10), %s124_s4, 64, %s127_s30, %s112_s6  }
  0x22   : > { %p132_p8 = pnand %p349_p11, %p131_p12 }
  0x23   : > { %s137_s19 = sand.u32 (!%p132_p8), 1, %s498_s7  }
  0x24   : > { %135 = sbr.rel (%p132_p8) target bundleno = 229 (0xe5), region = 24  ;;  %s350_s22 = sshll.u32 (!%p132_p8), %s137_s19, 2 }
  0x25   : > { %s138_s23 = scalar_lea.sflag (!%p132_p8), [#allocation3], %s137_s19  ;;  %s141_s24 = scalar_lea.vmem (!%p132_p8), [#allocation2], %s350_s22 }
  0x29   : > { %489 = dma.done.wait (%p592_p7), %s138_s23, 64  }
  0x2a   : > { %491 = vsyncadd (%p592_p7), %s138_s23, 4294967232  ;;  %v180_v0 = vld [vmem:[%s141_s24] sm:$0xf]  ;;  %s351_s25 = sshll.u32 %s506_s9, 4  ;;  %p168_p9 = scmp.lt.s32.totalorder %s510_s10, 1  ;;  %vm213_vm0 = vcmask 31744  }
  0x2b   : > { %181 = vxpose.xlu0.b32.start.end [1/1] (short) %v180_v0, 128  ;;  %p170_p10 = scmp.lt.s32.totalorder %s351_s25, 31 }
  0x2c   : > { %s714_s10 = smov (!%p168_p9, %s510_s10), 1 }
  0x2d   : > { %s716_s25 = smov (!%p170_p10, %s351_s25), 31  ;;  %s352_s27 = sshll.u32 %s714_s10, 5 }
  0x2e   : > { %s176_s28 = sadd.s32 %s352_s27, %s716_s25 }
  0x2f   : > { %s353_s29 = sshll.u32 %s176_s28, 3 }
  0x30   : > { %s637_s3 = scalar_lea.vmem %s696_s1, %s353_s29 }
  0xa7   : > { %v197_v1 = vpop.trf.xlu0 }
  0xa8   : > { %214 = vst.msk [vmem:[%s637_s3] sm:$0xff] %vm213_vm0, %v197_v1 }
  0xab   : > { %v198_v2 = vpop.trf.xlu0 }
  0xac   : > { %215 = vst.msk [vmem:[%s637_s3 + $0x8] sm:$0xff] %vm213_vm0, %v198_v2 }
  0xaf   : > { %v199_v3 = vpop.trf.xlu0 }
  0xb0   : > { %216 = vst.msk [vmem:[%s637_s3 + $0x10] sm:$0xff] %vm213_vm0, %v199_v3 }
  0xb3   : > { %v200_v4 = vpop.trf.xlu0 }
  0xb4   : > { %217 = vst.msk [vmem:[%s637_s3 + $0x18] sm:$0xff] %vm213_vm0, %v200_v4 }
  0xb7   : > { %v201_v5 = vpop.trf.xlu0 }
  0xb8   : > { %218 = vst.msk [vmem:[%s637_s3 + $0x20] sm:$0xff] %vm213_vm0, %v201_v5 }
  0xbb   : > { %v202_v6 = vpop.trf.xlu0 }
  0xbc   : > { %219 = vst.msk [vmem:[%s637_s3 + $0x28] sm:$0xff] %vm213_vm0, %v202_v6 }
  0xbf   : > { %v203_v7 = vpop.trf.xlu0 }
  0xc0   : > { %220 = vst.msk [vmem:[%s637_s3 + $0x30] sm:$0xff] %vm213_vm0, %v203_v7 }
  0xc3   : > { %v204_v8 = vpop.trf.xlu0 }
  0xc4   : > { %221 = vst.msk [vmem:[%s637_s3 + $0x38] sm:$0xff] %vm213_vm0, %v204_v8 }
  0xc7   : > { %v205_v9 = vpop.trf.xlu0 }
  0xc8   : > { %222 = vst.msk [vmem:[%s637_s3 + $0x40] sm:$0xff] %vm213_vm0, %v205_v9 }
  0xcb   : > { %v206_v10 = vpop.trf.xlu0 }
  0xcc   : > { %223 = vst.msk [vmem:[%s637_s3 + $0x48] sm:$0xff] %vm213_vm0, %v206_v10 }
  0xcf   : > { %v207_v11 = vpop.trf.xlu0 }
  0xd0   : > { %224 = vst.msk [vmem:[%s637_s3 + $0x50] sm:$0xff] %vm213_vm0, %v207_v11 }
  0xd3   : > { %v208_v12 = vpop.trf.xlu0 }
  0xd4   : > { %225 = vst.msk [vmem:[%s637_s3 + $0x58] sm:$0xff] %vm213_vm0, %v208_v12 }
  0xd7   : > { %v209_v13 = vpop.trf.xlu0 }
  0xd8   : > { %226 = vst.msk [vmem:[%s637_s3 + $0x60] sm:$0xff] %vm213_vm0, %v209_v13 }
  0xdb   : > { %v210_v14 = vpop.trf.xlu0 }
  0xdc   : > { %227 = vst.msk [vmem:[%s637_s3 + $0x68] sm:$0xff] %vm213_vm0, %v210_v14 }
  0xdf   : > { %v211_v15 = vpop.trf.xlu0 }
  0xe0   : > { %228 = vst.msk [vmem:[%s637_s3 + $0x70] sm:$0xff] %vm213_vm0, %v211_v15 }
  0xe3   : > { %v212_v16 = vpop.trf.xlu0 }
  0xe4   : > { %229 = vst.msk [vmem:[%s637_s3 + $0x78] sm:$0xff] %vm213_vm0, %v212_v16 }
  0xe5 PF: > { %s14_s13 = sadd.s32 1, %s522_s13   ;;  %s700_s6 = smov %s498_s7 }
  0xe6   : > { %p11_p7 = scmp.ge.s32.totalorder %s14_s13, 6   ;;  %s701_s7 = smov %s502_s8 }
  0xe7   : > { %s702_s8 = smov %s602_s26  ;;  %s703_s9 = smov %s514_s11 }
  0xe8   : > { %s704_s10 = smov %s518_s12  ;;  %s705_s11 = smov %s708_s15 }
  0xe9   : > { %s706_s12 = smov %s712_s16  ;;  %13 = sbr.rel (!%p11_p7) target bundleno = 5 (0x5), region = 64 }
  0xee   :  { %266 = vsyncpa [#allocation3], 1 }
  0xef   :  { %268 = vsyncpa [#allocation3 + $0x1], 1 }

</bundles_post_ra>
